<compile_context>
chip_gen: v7x
topology: tpu7x:2x2x1
jax: 0.10.0
libtpu: 0.0.40
codegen_flags: <defaults>
</compile_context>

<pallas_src>
import functools

import jax
import jax.numpy as jnp
from jax.experimental import pallas as pl
from jax.experimental.pallas import tpu as pltpu


def _round_up(x, m):
    return ((x + m - 1) // m) * m


def _xw_kernel(x_ref, w_ref, o_ref):
    # (tile_k, in_feats) @ (in_feats, out_pad) -> (tile_k, out_pad), f32
    o_ref[...] = jnp.dot(x_ref[...], w_ref[...], preferred_element_type=jnp.float32)


def _gcn_agg_kernel(nz_ref, a_ref, xw_ref, b_ref, o_ref, acc_ref):
    # nz_ref : SMEM (num_row_tiles * num_k_tiles,) int32 block-nonzero flags
    # a_ref  : (tile_n, tile_k) bf16 adjacency tile (dest rows x source cols)
    # xw_ref : (tile_k, out_pad) f32 precomputed X @ W tile
    # b_ref  : (1, out_pad) f32 bias
    # o_ref  : (tile_n, out_pad) output tile
    # acc_ref: (tile_n, out_pad) f32 accumulator scratch (lives across k steps)
    i = pl.program_id(0)
    k = pl.program_id(1)
    nk = pl.num_programs(1)

    @pl.when(k == 0)
    def _():
        acc_ref[...] = jnp.zeros_like(acc_ref)

    # Skip all-zero adjacency tiles: contributes exactly 0 to the accumulator.
    @pl.when(nz_ref[i * nk + k] != 0)
    def _():
        acc_ref[...] += jnp.dot(
            a_ref[...].astype(jnp.float32),
            xw_ref[...],
            preferred_element_type=jnp.float32,
        )

    @pl.when(k == nk - 1)
    def _():
        o_ref[...] = (acc_ref[...] + b_ref[...]).astype(o_ref.dtype)


@functools.partial(jax.jit, static_argnames=("tile_n", "tile_k"))
def gcn_layer(adj, x, w, b, *, tile_n=256, tile_k=512):
    """adj: [N, N] with adj[i, j] = 1 iff edge j->i; x: [N, in_feats];
    w: [in_feats, out_feats] (pre-transposed vs. PyTorch); b: [out_feats]."""
    N, in_feats = x.shape
    out_feats = w.shape[1]

    out_pad = _round_up(out_feats, 128)         # lane-dense output slab
    tile_n = min(tile_n, _round_up(N, 128))     # clamp tiles to problem size
    tile_k = min(tile_k, _round_up(N, 128))
    n_rows = _round_up(N, tile_n)               # padded destination-node count
    n_cols = _round_up(N, tile_k)               # padded source-node count

    # bf16 adjacency (0/1 exact) halves the dominant N^2 HBM stream.
    # Zero-padded rows/cols contribute nothing to the aggregation.
    adj_p = jnp.pad(adj, ((0, n_rows - N), (0, n_cols - N))).astype(jnp.bfloat16)
    x_p = jnp.pad(x.astype(jnp.float32), ((0, n_cols - N), (0, 0)))
    w_p = jnp.pad(w.astype(jnp.float32), ((0, 0), (0, out_pad - out_feats)))
    b_p = jnp.pad(b.astype(jnp.float32), (0, out_pad - out_feats)).reshape(1, out_pad)

    # ---- prologue: XW = X @ W_pad (tiny vs. the N^2 adjacency traffic) ----
    xw = pl.pallas_call(
        _xw_kernel,
        out_shape=jax.ShapeDtypeStruct((n_cols, out_pad), jnp.float32),
        grid_spec=pltpu.PrefetchScalarGridSpec(
            num_scalar_prefetch=0,
            grid=(n_cols // tile_k,),
            in_specs=[
                pl.BlockSpec((tile_k, in_feats), lambda i: (i, 0)),
                pl.BlockSpec((in_feats, out_pad), lambda i: (0, 0)),
            ],
            out_specs=pl.BlockSpec((tile_k, out_pad), lambda i: (i, 0)),
        ),
        compiler_params=pltpu.CompilerParams(dimension_semantics=("parallel",)),
        cost_estimate=pl.CostEstimate(
            flops=2 * n_cols * in_feats * out_pad,
            transcendentals=0,
            bytes_accessed=4 * (n_cols * in_feats + in_feats * out_pad + n_cols * out_pad),
        ),
    )(x_p, w_p)

    # ---- main kernel: out = A @ XW + b, K-tiled over source nodes ----
    gi, gk = n_rows // tile_n, n_cols // tile_k

    # Per-(row-tile, k-tile) nonzero flags, flattened to 1-D (avoids 2-D SMEM padding).
    nz = jnp.any(adj_p.reshape(gi, tile_n, gk, tile_k) != 0, axis=(1, 3))
    nz = nz.astype(jnp.int32).reshape(gi * gk)

    # VMEM budget: double-buffered A / XW / bias / out tiles + f32 accumulator.
    vmem_bytes = (
        2 * tile_n * tile_k * 2        # A tiles (bf16)
        + 2 * tile_k * out_pad * 4     # XW tiles
        + 2 * out_pad * 4              # bias
        + 2 * tile_n * out_pad * 4     # output tiles
        + tile_n * out_pad * 4         # accumulator scratch
    )
    vmem_limit = int(min(max(2 * vmem_bytes, 8 << 20), 32 << 20))

    out = pl.pallas_call(
        _gcn_agg_kernel,
        out_shape=jax.ShapeDtypeStruct((n_rows, out_pad), x.dtype),
        grid_spec=pltpu.PrefetchScalarGridSpec(
            num_scalar_prefetch=1,                       # nz flag table -> SMEM
            grid=(gi, gk),                               # reduction axis last
            in_specs=[
                pl.BlockSpec((tile_n, tile_k), lambda i, k, nz_ref: (i, k)),
                pl.BlockSpec((tile_k, out_pad), lambda i, k, nz_ref: (k, 0)),
                pl.BlockSpec((1, out_pad), lambda i, k, nz_ref: (0, 0)),
            ],
            out_specs=pl.BlockSpec((tile_n, out_pad), lambda i, k, nz_ref: (i, 0)),
            scratch_shapes=[pltpu.VMEM((tile_n, out_pad), jnp.float32)],
        ),
        compiler_params=pltpu.CompilerParams(
            dimension_semantics=("parallel", "arbitrary"),
            vmem_limit_bytes=vmem_limit,
        ),
        cost_estimate=pl.CostEstimate(
            flops=2 * n_rows * n_cols * out_pad,
            transcendentals=0,
            bytes_accessed=(2 * n_rows * n_cols            # bf16 adjacency
                            + 4 * gi * n_cols * out_pad    # XW re-read per row tile
                            + 4 * n_rows * out_pad),       # output
        ),
    )(nz, adj_p, xw, b_p)

    return out[:N, :out_feats]


if __name__ == "__main__":
    key = jax.random.PRNGKey(0)
    k_adj, k_x, k_w, k_b = jax.random.split(key, 4)

    N = 256          # number of graph nodes
    in_feats = 32
    out_feats = 64

    # Deterministic synthetic graph: ~10% edge density. adj[i, j] = 1.0 iff edge j -> i.
    adj = (jax.random.uniform(k_adj, (N, N)) < 0.1).astype(jnp.float32)

    # Node features.
    x = jax.random.normal(k_x, (N, in_feats), dtype=jnp.float32)

    # Deterministic "nn.Linear(in_feats, out_feats)" parameters (uniform init, like PyTorch).
    bound = 1.0 / (in_feats ** 0.5)
    w_pt = jax.random.uniform(k_w, (out_feats, in_feats), minval=-bound, maxval=bound)
    b = jax.random.uniform(k_b, (out_feats,), minval=-bound, maxval=bound)
    w = w_pt.T  # [in_feats, out_feats] for the kernel

    # Small tiles here so the 2-D (row-tile, k-tile) grid / accumulator path is exercised.
    out = gcn_layer(adj, x, w, b, tile_n=128, tile_k=128)
    out = jax.block_until_ready(out)

    # Pure-JAX reference of the exact forward semantics (f32, original association).
    ref = (adj @ x) @ w + b[None, :]
    assert out.shape == (N, out_feats)
    assert jnp.allclose(out, ref, atol=1e-3, rtol=1e-3), "mismatch vs reference"

    print("KERNEL_OK")
</pallas_src>

<mosaic_0001>
module attributes {stable_mosaic.version = 11 : i64} {
  func.func @_xw_kernel(%arg0: i32, %arg1: memref<128x32xf32, #tpu.memory_space<vmem>>, %arg2: memref<32x128xf32, #tpu.memory_space<vmem>>, %arg3: memref<128x128xf32, #tpu.memory_space<vmem>>) attributes {dimension_semantics = [#tpu.dimension_semantics<parallel>], iteration_bounds = array<i64: 2>, scalar_prefetch = 0 : i64, scratch_operands = 0 : i64, tpu.core_type = #tpu.core_type<tc>, window_params = [{transform_indices = @transform_0, window_bounds = array<i64: 128, 32>}, {pipeline_mode = #tpu.pipeline_mode<synchronous>, transform_indices = @transform_1, window_bounds = array<i64: 32, 128>}, {transform_indices = @transform_2, window_bounds = array<i64: 128, 128>}]} {
    %c0 = arith.constant 0 : index
    %c0_0 = arith.constant 0 : index
    %0 = vector.load %arg1[%c0, %c0_0] : memref<128x32xf32, #tpu.memory_space<vmem>>, vector<128x32xf32>
    %c0_1 = arith.constant 0 : index
    %c0_2 = arith.constant 0 : index
    %1 = vector.load %arg2[%c0_1, %c0_2] : memref<32x128xf32, #tpu.memory_space<vmem>>, vector<32x128xf32>
    %cst = arith.constant dense<0.000000e+00> : vector<128x128xf32>
    %2 = tpu.matmul %0, %1, %cst {dimension_numbers = #tpu.dot_dimension_numbers<[1], [0], [0], [1], [0, 0, 1, 1], [], []>} : vector<128x32xf32>, vector<32x128xf32>, vector<128x128xf32> -> vector<128x128xf32>
    %c0_3 = arith.constant 0 : index
    %c0_4 = arith.constant 0 : index
    %3 = vector.load %arg3[%c0_3, %c0_4] : memref<128x128xf32, #tpu.memory_space<vmem>>, vector<128x128xf32>
    tpu.vector_store %arg3[%c0_3, %c0_4], %2 {strides = array<i32>} : memref<128x128xf32, #tpu.memory_space<vmem>>, vector<128x128xf32>,
    return
  }
  func.func @transform_0(%arg0: i32) -> (i32, i32) {
    %c0_i32 = arith.constant 0 : i32
    %c0_i32_0 = arith.constant 0 : i32
    return %arg0, %c0_i32 : i32, i32
  }
  func.func @transform_1(%arg0: i32) -> (i32, i32) {
    %c0_i32 = arith.constant 0 : i32
    %c0_i32_0 = arith.constant 0 : i32
    %c0_i32_1 = arith.constant 0 : i32
    return %c0_i32, %c0_i32_0 : i32, i32
  }
  func.func @transform_2(%arg0: i32) -> (i32, i32) {
    %c0_i32 = arith.constant 0 : i32
    %c0_i32_0 = arith.constant 0 : i32
    return %arg0, %c0_i32 : i32, i32
  }
}

module attributes {stable_mosaic.version = 11 : i64} {
  func.func @_gcn_agg_kernel(%arg0: i32, %arg1: i32, %arg2: memref<4xi32, #tpu.memory_space<smem>>, %arg3: memref<128x128xbf16, #tpu.memory_space<vmem>>, %arg4: memref<128x128xf32, #tpu.memory_space<vmem>>, %arg5: memref<1x128xf32, #tpu.memory_space<vmem>>, %arg6: memref<128x128xf32, #tpu.memory_space<vmem>>, %arg7: memref<128x128xf32, #tpu.memory_space<vmem>>) attributes {dimension_semantics = [#tpu.dimension_semantics<parallel>, #tpu.dimension_semantics<arbitrary>], iteration_bounds = array<i64: 2, 2>, scalar_prefetch = 1 : i64, scratch_operands = 1 : i64, tpu.core_type = #tpu.core_type<tc>, window_params = [{transform_indices = @transform_0, window_bounds = array<i64: 128, 128>}, {transform_indices = @transform_1, window_bounds = array<i64: 128, 128>}, {pipeline_mode = #tpu.pipeline_mode<synchronous>, transform_indices = @transform_2, window_bounds = array<i64: 1, 128>}, {transform_indices = @transform_3, window_bounds = array<i64: 128, 128>}]} {
    %c0_i32 = arith.constant 0 : i32
    %0 = arith.cmpi eq, %arg1, %c0_i32 : i32
    %1 = arith.extui %0 : i1 to i32
    %c0_i32_0 = arith.constant 0 : i32
    %2 = arith.cmpi ne, %1, %c0_i32_0 : i32
    scf.if %2 {
      %cst = arith.constant 0.000000e+00 : f32
      %13 = vector.broadcast %cst : f32 to vector<128x128xf32>
      %c0 = arith.constant 0 : index
      %c0_4 = arith.constant 0 : index
      %14 = vector.load %arg7[%c0, %c0_4] : memref<128x128xf32, #tpu.memory_space<vmem>>, vector<128x128xf32>
      tpu.vector_store %arg7[%c0, %c0_4], %13 {strides = array<i32>} : memref<128x128xf32, #tpu.memory_space<vmem>>, vector<128x128xf32>,
    } else {
    }
    %c2_i32 = arith.constant 2 : i32
    %3 = arith.muli %arg0, %c2_i32 : i32
    %4 = arith.addi %3, %arg1 : i32
    %5 = arith.index_cast %4 : i32 to index
    %6 = memref.load %arg2[%5] : memref<4xi32, #tpu.memory_space<smem>>
    %c0_i32_1 = arith.constant 0 : i32
    %7 = arith.cmpi ne, %6, %c0_i32_1 : i32
    %8 = arith.extui %7 : i1 to i32
    %c0_i32_2 = arith.constant 0 : i32
    %9 = arith.cmpi ne, %8, %c0_i32_2 : i32
    scf.if %9 {
      %c0 = arith.constant 0 : index
      %c0_4 = arith.constant 0 : index
      %13 = vector.load %arg7[%c0, %c0_4] : memref<128x128xf32, #tpu.memory_space<vmem>>, vector<128x128xf32>
      %c0_5 = arith.constant 0 : index
      %c0_6 = arith.constant 0 : index
      %14 = vector.load %arg3[%c0_5, %c0_6] : memref<128x128xbf16, #tpu.memory_space<vmem>>, vector<128x128xbf16>
      %15 = arith.extf %14 : vector<128x128xbf16> to vector<128x128xf32>
      %c0_7 = arith.constant 0 : index
      %c0_8 = arith.constant 0 : index
      %16 = vector.load %arg4[%c0_7, %c0_8] : memref<128x128xf32, #tpu.memory_space<vmem>>, vector<128x128xf32>
      %cst = arith.constant dense<0.000000e+00> : vector<128x128xf32>
      %17 = tpu.matmul %15, %16, %cst {dimension_numbers = #tpu.dot_dimension_numbers<[1], [0], [0], [1], [0, 0, 1, 1], [], []>} : vector<128x128xf32>, vector<128x128xf32>, vector<128x128xf32> -> vector<128x128xf32>
      %18 = arith.addf %13, %17 : vector<128x128xf32>
      %c0_9 = arith.constant 0 : index
      %c0_10 = arith.constant 0 : index
      %19 = vector.load %arg7[%c0_9, %c0_10] : memref<128x128xf32, #tpu.memory_space<vmem>>, vector<128x128xf32>
      tpu.vector_store %arg7[%c0_9, %c0_10], %18 {strides = array<i32>} : memref<128x128xf32, #tpu.memory_space<vmem>>, vector<128x128xf32>,
    } else {
    }
    %c1_i32 = arith.constant 1 : i32
    %10 = arith.cmpi eq, %arg1, %c1_i32 : i32
    %11 = arith.extui %10 : i1 to i32
    %c0_i32_3 = arith.constant 0 : i32
    %12 = arith.cmpi ne, %11, %c0_i32_3 : i32
    scf.if %12 {
      %c0 = arith.constant 0 : index
      %c0_4 = arith.constant 0 : index
      %13 = vector.load %arg7[%c0, %c0_4] : memref<128x128xf32, #tpu.memory_space<vmem>>, vector<128x128xf32>
      %c0_5 = arith.constant 0 : index
      %c0_6 = arith.constant 0 : index
      %14 = vector.load %arg5[%c0_5, %c0_6] : memref<1x128xf32, #tpu.memory_space<vmem>>, vector<1x128xf32>
      %15 = vector.broadcast %14 : vector<1x128xf32> to vector<128x128xf32>
      %16 = arith.addf %13, %15 : vector<128x128xf32>
      %c0_7 = arith.constant 0 : index
      %c0_8 = arith.constant 0 : index
      %17 = vector.load %arg6[%c0_7, %c0_8] : memref<128x128xf32, #tpu.memory_space<vmem>>, vector<128x128xf32>
      tpu.vector_store %arg6[%c0_7, %c0_8], %16 {strides = array<i32>} : memref<128x128xf32, #tpu.memory_space<vmem>>, vector<128x128xf32>,
    } else {
    }
    return
  }
  func.func @transform_0(%arg0: i32, %arg1: i32, %arg2: memref<4xi32, #tpu.memory_space<smem>>) -> (i32, i32) {
    %c0_i32 = arith.constant 0 : i32
    return %arg0, %arg1 : i32, i32
  }
  func.func @transform_1(%arg0: i32, %arg1: i32, %arg2: memref<4xi32, #tpu.memory_space<smem>>) -> (i32, i32) {
    %c0_i32 = arith.constant 0 : i32
    %c0_i32_0 = arith.constant 0 : i32
    return %arg1, %c0_i32 : i32, i32
  }
  func.func @transform_2(%arg0: i32, %arg1: i32, %arg2: memref<4xi32, #tpu.memory_space<smem>>) -> (i32, i32) {
    %c0_i32 = arith.constant 0 : i32
    %c0_i32_0 = arith.constant 0 : i32
    %c0_i32_1 = arith.constant 0 : i32
    return %c0_i32, %c0_i32_0 : i32, i32
  }
  func.func @transform_3(%arg0: i32, %arg1: i32, %arg2: memref<4xi32, #tpu.memory_space<smem>>) -> (i32, i32) {
    %c0_i32 = arith.constant 0 : i32
    %c0_i32_0 = arith.constant 0 : i32
    return %arg0, %c0_i32 : i32, i32
  }
}

</mosaic_0001>

<bundles_post_ra>
// kernel: gcn_layer.2
= control target key start
LH: loop header
LB: loop body
LE: loop exit
PB: predicated region body
PF: predicated region fallthrough
CT: control target
= control target key end

     0   :  { %s555_s9 = smov 0   ;;  %s643_s0 = inlined_call_operand.vmem [shape: f32[256,32], index: 0, kind: input, shape index: {}]   ;;  %s644_s1 = inlined_call_operand.vmem [shape: f32[32,128], index: 1, kind: input, shape index: {}]   ;;  %s645_s2 = inlined_call_operand.vmem [shape: f32[256,128], index: 2, kind: output, shape index: {}]  }
   0x1 LB: > { %s433_s10 = sadd.s32 4294967295, %s538_s9   ;;  %p437_p0 = scmp.ge.s32.totalorder %s538_s9, 1  ;;  %s538_s9 = sphi %s555_s9, %s12_s9  }
   0x2   : > { %p113_p1 = scmp.lt.s32.totalorder %s538_s9, 3 }
   0x4   : > { %p114_p2 = pnand %p437_p0, %p113_p1 }
   0x5   : > { %v163_v0 = vld [vmem:[%s644_s1] sm:$0xff] (!%p114_p2)  ;;  %v164_v1 = vld [vmem:[%s644_s1 + $0x8] sm:$0xff] (!%p114_p2)  ;;  %v165_v2 = vld [vmem:[%s644_s1 + $0x10] sm:$0xff] (!%p114_p2)  ;;  %s438_s17 = sshll.u32 (!%p114_p2), %s433_s10, 4  ;;  %vm167_vm0 = vcmask (!%p114_p2), 261120  }
   0x6   : > { %117 = sbr.rel (%p114_p2) target bundleno = 245 (0xf5), region = 28  ;;  %v512_v3 = vpack.c.bf16 (!%p114_p2), %v164_v1, %v163_v0  ;;  %v166_v4 = vld [vmem:[%s644_s1 + $0x18] sm:$0xff] (!%p114_p2)  ;;  %p136_p3 = scmp.lt.s32.totalorder (!%p114_p2), %s438_s17, 31 }
   0x7   : > { %v516_v5 = vpack.c.bf16 (!%p114_p2), %v166_v4, %v165_v2 }
   0x8   : > { %513 = vmatprep.subr.bf16.mxu0 (!%p114_p2), %v512_v3  ;;  %520 = vmatprep.subr.bf16.mxu1 (!%p114_p2), %v512_v3 }
   0x9   : > { %515 = vmatpush3.bf16.msra.mxu0 (!%p114_p2), %v512_v3  ;;  %522 = vmatpush3.bf16.msra.mxu1 (!%p114_p2), %v512_v3 }
   0xa   : > { %517 = vmatprep.subr.bf16.mxu0 (!%p114_p2), %v516_v5  ;;  %521 = vmatprep.subr.bf16.mxu1 (!%p114_p2), %v516_v5 }
   0xd   : > { %s647_s17 = smov (!%p136_p3, %s438_s17), 31  ;;  %519 = vmatpush3.bf16.msra.mxu0 %v516_v5  ;;  %523 = vmatpush3.bf16.msra.mxu1 %v516_v5 }
   0xe   : > { %s439_s20 = sshll.u32 %s647_s17, 3 }
   0xf   : > { %s583_s23 = scalar_lea.vmem %s643_s0, %s439_s20  ;;  %s622_s26 = scalar_lea.vmem %s645_s2, %s439_s20 }
  0x10   : > { %v147_v6 = vld [vmem:[%s583_s23] sm:$0xff]  ;;  %v148_v8 = vld [vmem:[%s583_s23 + $0x8] sm:$0xff]  ;;  %v149_v10 = vld [vmem:[%s583_s23 + $0x10] sm:$0xff] }
  0x11   : > { %v155_v7 = vld [vmem:[%s583_s23 + $0x40] sm:$0xff]  ;;  %v156_v9 = vld [vmem:[%s583_s23 + $0x48] sm:$0xff]  ;;  %488 = vmatprep.mubr.msk.f32.mxu0 %vm167_vm0, %v147_v6  ;;  %v157_v11 = vld [vmem:[%s583_s23 + $0x50] sm:$0xff] }
  0x12   : > { %500 = vmatprep.mubr.msk.f32.mxu1 %vm167_vm0, %v155_v7  ;;  %489 = vmatmul.mubr.msk.f32.vlgmr.msra.gmra.mrb[0].mxu0 %vm167_vm0, %v148_v8  ;;  %v150_v12 = vld [vmem:[%s583_s23 + $0x18] sm:$0xff]  ;;  %v151_v14 = vld [vmem:[%s583_s23 + $0x20] sm:$0xff]  ;;  %v152_v16 = vld [vmem:[%s583_s23 + $0x28] sm:$0xff] }
  0x13   : > { %501 = vmatmul.mubr.msk.f32.vlgmr.msra.gmra.mrb[0].mxu1 %vm167_vm0, %v156_v9  ;;  %491 = vmatprep.mubr.msk.f32.mxu0 %vm167_vm0, %v149_v10  ;;  %v158_v13 = vld [vmem:[%s583_s23 + $0x58] sm:$0xff]  ;;  %v159_v15 = vld [vmem:[%s583_s23 + $0x60] sm:$0xff]  ;;  %v160_v17 = vld [vmem:[%s583_s23 + $0x68] sm:$0xff] }
  0x14   : > { %503 = vmatprep.mubr.msk.f32.mxu1 %vm167_vm0, %v157_v11  ;;  %v153_v18 = vld [vmem:[%s583_s23 + $0x30] sm:$0xff]  ;;  %v154_v20 = vld [vmem:[%s583_s23 + $0x38] sm:$0xff] }
  0x15   : > { %v161_v19 = vld [vmem:[%s583_s23 + $0x70] sm:$0xff]  ;;  %v162_v21 = vld [vmem:[%s583_s23 + $0x78] sm:$0xff] }
  0x16   : > { %492 = vmatmul.mubr.msk.f32.gmra.mrb[2].mxu0 %vm167_vm0, %v150_v12 }
  0x17   : > { %504 = vmatmul.mubr.msk.f32.gmra.mrb[2].mxu1 %vm167_vm0, %v158_v13  ;;  %494 = vmatprep.mubr.msk.f32.mxu0 %vm167_vm0, %v151_v14 }
  0x18   : > { %506 = vmatprep.mubr.msk.f32.mxu1 %vm167_vm0, %v159_v15 }
  0x1a   : > { %495 = vmatmul.mubr.msk.f32.gmra.mrb[4].mxu0 %vm167_vm0, %v152_v16 }
  0x1b   : > { %507 = vmatmul.mubr.msk.f32.gmra.mrb[4].mxu1 %vm167_vm0, %v160_v17  ;;  %497 = vmatprep.mubr.msk.f32.mxu0 %vm167_vm0, %v153_v18 }
  0x1c   : > { %509 = vmatprep.mubr.msk.f32.mxu1 %vm167_vm0, %v161_v19 }
  0x1e   : > { %498 = vmatmul.mubr.msk.f32.gmra.mrb[6].mxu0 %vm167_vm0, %v154_v20 }
  0x1f   : > { %510 = vmatmul.mubr.msk.f32.gmra.mrb[6].mxu1 %vm167_vm0, %v162_v21 }
  0xe5   : > { %v490_v22 = vpop.f32.mrb[0].mxu0 }
  0xe6   : > { %v502_v23 = vpop.f32.mrb[0].mxu1  ;;  %362 = vst [vmem:[%s622_s26 + $0x8] sm:$0xff] %v490_v22  ;;  %v282_v24 = vpop.f32.mrb[1].mxu0 }
  0xe7   : > { %370 = vst [vmem:[%s622_s26 + $0x48] sm:$0xff] %v502_v23  ;;  %v322_v25 = vpop.f32.mrb[1].mxu1  ;;  %361 = vst [vmem:[%s622_s26] sm:$0xff] %v282_v24 }
  0xe8   : > { %369 = vst [vmem:[%s622_s26 + $0x40] sm:$0xff] %v322_v25 }
  0xe9   : > { %v493_v26 = vpop.f32.mrb[2].mxu0 }
  0xea   : > { %v505_v27 = vpop.f32.mrb[2].mxu1  ;;  %364 = vst [vmem:[%s622_s26 + $0x18] sm:$0xff] %v493_v26  ;;  %v292_v28 = vpop.f32.mrb[3].mxu0 }
  0xeb   : > { %372 = vst [vmem:[%s622_s26 + $0x58] sm:$0xff] %v505_v27  ;;  %v332_v29 = vpop.f32.mrb[3].mxu1  ;;  %363 = vst [vmem:[%s622_s26 + $0x10] sm:$0xff] %v292_v28 }
  0xec   : > { %371 = vst [vmem:[%s622_s26 + $0x50] sm:$0xff] %v332_v29 }
  0xed   : > { %v496_v30 = vpop.f32.mrb[4].mxu0 }
  0xee   : > { %v508_v31 = vpop.f32.mrb[4].mxu1  ;;  %366 = vst [vmem:[%s622_s26 + $0x28] sm:$0xff] %v496_v30  ;;  %v302_v32 = vpop.f32.mrb[5].mxu0 }
  0xef   : > { %374 = vst [vmem:[%s622_s26 + $0x68] sm:$0xff] %v508_v31  ;;  %v342_v33 = vpop.f32.mrb[5].mxu1  ;;  %365 = vst [vmem:[%s622_s26 + $0x20] sm:$0xff] %v302_v32 }
  0xf0   : > { %373 = vst [vmem:[%s622_s26 + $0x60] sm:$0xff] %v342_v33 }
  0xf1   : > { %v499_v34 = vpop.f32.mrb[6].mxu0 }
  0xf2   : > { %v511_v35 = vpop.f32.mrb[6].mxu1  ;;  %368 = vst [vmem:[%s622_s26 + $0x38] sm:$0xff] %v499_v34  ;;  %v312_v36 = vpop.f32.mrb[7].mxu0 }
  0xf3   : > { %376 = vst [vmem:[%s622_s26 + $0x78] sm:$0xff] %v511_v35  ;;  %v352_v37 = vpop.f32.mrb[7].mxu1  ;;  %367 = vst [vmem:[%s622_s26 + $0x30] sm:$0xff] %v312_v36 }
  0xf4   : > { %375 = vst [vmem:[%s622_s26 + $0x70] sm:$0xff] %v352_v37 }
  0xf5 PF: > { %s12_s9 = sadd.s32 1, %s538_s9  }
  0xf6   : > { %p9_p4 = scmp.ge.s32.totalorder %s12_s9, 4  }
  0xf8   :  { %11 = sbr.rel (!%p9_p4) target bundleno = 1 (0x1), region = 58 }

// kernel: gcn_layer.3
= control target key start
LH: loop header
LB: loop body
LE: loop exit
PB: predicated region body
PF: predicated region fallthrough
CT: control target
= control target key end

     0   :  { %s1253_s0 = inlined_call_operand.vmem [shape: s32[4], index: 0, kind: input, shape index: {}]   ;;  %s1254_s1 = inlined_call_operand.vmem [shape: bf16[256,256], index: 1, kind: input, shape index: {}]   ;;  %s1255_s2 = inlined_call_operand.vmem [shape: f32[256,128], index: 2, kind: input, shape index: {}]   ;;  %s1256_s3 = inlined_call_operand.vmem [shape: f32[1,128], index: 3, kind: input, shape index: {}]   ;;  %s1257_s4 = inlined_call_operand.vmem [shape: f32[256,128], index: 4, kind: output, shape index: {}]  }
   0x1   :  { %s9_s17 = sshll.u32 %s1253_s0, 4  ;;  %s10_s17 = int_to_ptr.vmem [resolvable:$true] %s9_s17 }
   0x2   :  { %s990_s18 = scalar_lea.vmem %s10_s17, 16  ;;  %p995_p1 = scmp.lt.s32.totalorder %s10_s17, %s10_s17 }
   0x3   :  { %p991_p0 = scmp.ne.s32.totalorder %s10_s17, %s990_s18  ;;  %p996_p2 = scmp.lt.s32.totalorder %s990_s18, %s990_s18 }
   0x5   :  { %p997_p3 = por %p996_p2, %p995_p1 }
   0x7   :  { %p998_p4 = pnand %p997_p3, %p991_p0 }
   0x9   :  { %1001 = shalt.err (!%p998_p4)  }
   0xa   :  { %s1060_s19 = smov [#allocation4]  }
   0xb   :  { %12 = dma.vmem_to_smem %s10_s17, 16, %s1060_s19, [#allocation3] }
   0xc   :  { %1030 = dma.done.wait [#allocation3], 16 }
   0xd   :  { %1031 = vsyncadd [#allocation3], 4294967280 }
   0xe   :  { %14 = sfence }
   0xf   :  { %s1090_s20 = smov 0   ;;  %s1092_s21 = smov 0  }
  0x10   :  { %s1094_s22 = smov 0   ;;  %s1096_s0 = smov 0  }
  0x11   :  { %s1098_s23 = smov 0   ;;  %s1100_s24 = smov 0  }
  0x12   :  { %s1102_s25 = smov 0  }
  0x13 LB: > { %s29_s26 = sadd.s32 1, %s1050_s23  ;;  %s32_s27 = sadd.s32 1, %s1054_s24  ;;  %s1058_s25 = sphi %s1102_s25, %s20_s25   ;;  %s1054_s24 = sphi %s1100_s24, %s1263_s24   ;;  %s1050_s23 = sphi %s1098_s23, %s1262_s23   ;;  %s1046_s0 = sphi %s1096_s0, %s1261_s0   ;;  %s1042_s22 = sphi %s1094_s22, %s1260_s22   ;;  %s1038_s21 = sphi %s1092_s21, %s1259_s21   ;;  %s1034_s20 = sphi %s1090_s20, %s1258_s20  }
  0x14   : > { %p30_p5 = scmp.ge.s32.totalorder %s29_s26, 2  ;;  %p48_p6 = scmp.ne.s32.totalorder %s1038_s21, %s1034_s20 }
  0x15   : > { %p49_p7 = scmp.eq.s32.totalorder %s1058_s25, 0  ;;  %s41_s5 = sadd.s32 1, %s1038_s21 }
  0x16   : > { %s1265_s26 = smov (%p30_p5, %s29_s26), 0  ;;  %s1267_s27 = smov (!%p30_p5, %s32_s27), %s1054_s24 }
  0x17   : > { %p50_p8 = por %p49_p7, %p48_p6  ;;  %p34_p9 = scmp.ge.s32.totalorder %s1267_s27, 2 }
  0x18   : > { %s37_s28 = ssub.s32 %s1050_s23, %s1265_s26  ;;  %p738_p11 = scmp.ge.s32.totalorder %s1058_s25, 4 }
  0x19   : > { %s1269_s27 = smov (%p34_p9, %s1267_s27), 0 }
  0x1a   : > { %s36_s29 = ssub.s32 %s1054_s24, %s1269_s27  ;;  %150 = sbr.rel (%p738_p11) target bundleno = 49 (0x31), region = 20 }
  0x1b   : > { %s38_s30 = sor.u32 %s37_s28, %s36_s29 }
  0x1c   : > { %p39_p10 = scmp.eq.s32.totalorder %s38_s30, 0 }
  0x1e   : > { %s1141_s6 = scalar_select %p39_p10, %s1038_s21, %s41_s5  }
  0x21   : > { %153 = sbr.rel (!%p50_p8) target bundleno = 49 (0x31), region = 24  ;;  %s155_s7 = sand.u32 (%p50_p8), 1, %s1038_s21  }
  0x22   : > { %s756_s8 = sshll.u32 (%p50_p8), %s1054_s24, 5  ;;  %s739_s9 = sshll.u32 (%p50_p8), %s155_s7, 6 }
  0x23   : > { %s160_s10 = sadd.s32 (%p50_p8), %s1050_s23, %s756_s8  ;;  %s157_s15 = scalar_lea.vmem (%p50_p8), [#allocation5], %s739_s9 }
  0x24   : > { %s742_s11 = sshll.u32 (%p50_p8), %s160_s10, 2 }
  0x25   : > { %s1150_s14 = scalar_lea.vmem (%p50_p8), %s1254_s1, %s742_s11 }
  0x26   : > { %v178_v0 = vld [vmem:[%s1150_s14] sm:$0xf] (%p50_p8)  ;;  %v180_v1 = vld [vmem:[%s1150_s14 + $0x8] sm:$0xf] (%p50_p8)  ;;  %v182_v2 = vld [vmem:[%s1150_s14 + $0x10] sm:$0xf] (%p50_p8) }
  0x27   : > { %179 = vst [vmem:[%s157_s15] sm:$0xf] (%p50_p8), %v178_v0  ;;  %181 = vst [vmem:[%s157_s15 + $0x4] sm:$0xf] (%p50_p8), %v180_v1  ;;  %v184_v3 = vld [vmem:[%s1150_s14 + $0x18] sm:$0xf] (%p50_p8) }
  0x28   : > { %183 = vst [vmem:[%s157_s15 + $0x8] sm:$0xf] %v182_v2  ;;  %v186_v4 = vld [vmem:[%s1150_s14 + $0x20] sm:$0xf]  ;;  %v188_v5 = vld [vmem:[%s1150_s14 + $0x28] sm:$0xf] }
  0x29   : > { %185 = vst [vmem:[%s157_s15 + $0xc] sm:$0xf] %v184_v3  ;;  %187 = vst [vmem:[%s157_s15 + $0x10] sm:$0xf] %v186_v4  ;;  %v190_v6 = vld [vmem:[%s1150_s14 + $0x30] sm:$0xf] }
  0x2a   : > { %189 = vst [vmem:[%s157_s15 + $0x14] sm:$0xf] %v188_v5  ;;  %v192_v7 = vld [vmem:[%s1150_s14 + $0x38] sm:$0xf]  ;;  %v194_v8 = vld [vmem:[%s1150_s14 + $0x40] sm:$0xf] }
  0x2b   : > { %191 = vst [vmem:[%s157_s15 + $0x18] sm:$0xf] %v190_v6  ;;  %193 = vst [vmem:[%s157_s15 + $0x1c] sm:$0xf] %v192_v7  ;;  %v196_v9 = vld [vmem:[%s1150_s14 + $0x48] sm:$0xf] }
  0x2c   : > { %195 = vst [vmem:[%s157_s15 + $0x20] sm:$0xf] %v194_v8  ;;  %v198_v10 = vld [vmem:[%s1150_s14 + $0x50] sm:$0xf]  ;;  %v200_v11 = vld [vmem:[%s1150_s14 + $0x58] sm:$0xf] }
  0x2d   : > { %197 = vst [vmem:[%s157_s15 + $0x24] sm:$0xf] %v196_v9  ;;  %199 = vst [vmem:[%s157_s15 + $0x28] sm:$0xf] %v198_v10  ;;  %v202_v12 = vld [vmem:[%s1150_s14 + $0x60] sm:$0xf] }
  0x2e   : > { %201 = vst [vmem:[%s157_s15 + $0x2c] sm:$0xf] %v200_v11  ;;  %v204_v13 = vld [vmem:[%s1150_s14 + $0x68] sm:$0xf]  ;;  %v206_v14 = vld [vmem:[%s1150_s14 + $0x70] sm:$0xf] }
  0x2f   : > { %203 = vst [vmem:[%s157_s15 + $0x30] sm:$0xf] %v202_v12  ;;  %205 = vst [vmem:[%s157_s15 + $0x34] sm:$0xf] %v204_v13  ;;  %v208_v15 = vld [vmem:[%s1150_s14 + $0x78] sm:$0xf] }
  0x30   : > { %207 = vst [vmem:[%s157_s15 + $0x38] sm:$0xf] %v206_v14  ;;  %209 = vst [vmem:[%s157_s15 + $0x3c] sm:$0xf] %v208_v15 }
  0x31 PF: > { %p743_p12 = scmp.ge.s32.totalorder %s1058_s25, 1  ;;  %p272_p13 = scmp.lt.s32.totalorder %s1058_s25, 5 }
  0x33   : > { %p273_p0 = pnand %p743_p12, %p272_p13 }
  0x34   : > { %s279_s16 = sand.u32 (!%p273_p0), 1, %s1034_s20   ;;  %s745_s17 = sshll.u32 (!%p273_p0), %s1042_s22, 4 }
  0x35   : > { %276 = sbr.rel (%p273_p0) target bundleno = 355 (0x163), region = 69  ;;  %s744_s18 = sshll.u32 (!%p273_p0), %s279_s16, 6 }
  0x36   : > { %p309_p1 = scmp.lt.s32.totalorder (!%p273_p0), %s745_s17, 31  ;;  %s747_s19 = sshll.u32 (!%p273_p0), %s1046_s0, 4 }
  0x37   : > { %p315_p2 = scmp.lt.s32.totalorder (!%p273_p0), %s747_s19, 31  ;;  %s1183_s20 = scalar_lea.vmem (!%p273_p0), [#allocation5], %s744_s18 }
  0x38   : > { %p749_p3 = scmp.ne.s32.totalorder (!%p273_p0), %s1042_s22, 0 }
  0x3c   : > { %s1271_s17 = smov (!%p309_p1, %s745_s17), 31  ;;  %s1273_s19 = smov (!%p315_p2, %s747_s19), 31 }
  0x3d   : > { %s746_s28 = sshll.u32 %s1271_s17, 3  ;;  %s748_s7 = sshll.u32 %s1273_s19, 3  ;;  %v1061_v16 = vmov (!%p749_p3), 0.0  }
  0x3e   : > { %s1176_s5 = scalar_lea.vmem %s1255_s2, %s746_s28  ;;  %s1181_s10 = scalar_lea.vmem %s1257_s4, %s748_s7  ;;  %324 = vst [vmem:[#allocation2] sm:$0xff] (!%p749_p3), %v1061_v16  ;;  %325 = vst [vmem:[#allocation2 + $0x8] sm:$0xff] (!%p749_p3), %v1061_v16 }
  0x3f   : > { %323 = sbr.rel (%p749_p3) target bundleno = 70 (0x46), region = 77  ;;  %326 = vst [vmem:[#allocation2 + $0x10] sm:$0xff] (!%p749_p3), %v1061_v16  ;;  %327 = vst [vmem:[#allocation2 + $0x18] sm:$0xff] (!%p749_p3), %v1061_v16 }
  0x40   : > { %328 = vst [vmem:[#allocation2 + $0x20] sm:$0xff] (!%p749_p3), %v1061_v16  ;;  %329 = vst [vmem:[#allocation2 + $0x28] sm:$0xff] (!%p749_p3), %v1061_v16 }
  0x41   : > { %330 = vst [vmem:[#allocation2 + $0x30] sm:$0xff] (!%p749_p3), %v1061_v16  ;;  %331 = vst [vmem:[#allocation2 + $0x38] sm:$0xff] (!%p749_p3), %v1061_v16 }
  0x42   : > { %332 = vst [vmem:[#allocation2 + $0x40] sm:$0xff] (!%p749_p3), %v1061_v16  ;;  %333 = vst [vmem:[#allocation2 + $0x48] sm:$0xff] (!%p749_p3), %v1061_v16 }
  0x43   : > { %334 = vst [vmem:[#allocation2 + $0x50] sm:$0xff] (!%p749_p3), %v1061_v16  ;;  %335 = vst [vmem:[#allocation2 + $0x58] sm:$0xff] (!%p749_p3), %v1061_v16 }
  0x44   : > { %336 = vst [vmem:[#allocation2 + $0x60] sm:$0xff] (!%p749_p3), %v1061_v16  ;;  %337 = vst [vmem:[#allocation2 + $0x68] sm:$0xff] (!%p749_p3), %v1061_v16 }
  0x45   : > { %338 = vst [vmem:[#allocation2 + $0x70] sm:$0xff] (!%p749_p3), %v1061_v16  ;;  %339 = vst [vmem:[#allocation2 + $0x78] sm:$0xff] (!%p749_p3), %v1061_v16 }
  0x46 PF: > { %s750_s11 = sshll.u32 %s1046_s0, 1 }
  0x47   : > { %s341_s12 = sadd.s32 %s1042_s22, %s750_s11 }
  0x48   : > { %s342_s13 = sld [smem:[#allocation4 + %s341_s12]] }
  0x4e   : > { %p751_p4 = scmp.eq.s32.totalorder %s342_s13, 0 }
  0x4f   : > { %v395_v17 = vld [vmem:[%s1176_s5] sm:$0xff] (!%p751_p4)  ;;  %v396_v18 = vld [vmem:[%s1176_s5 + $0x8] sm:$0xff] (!%p751_p4)  ;;  %v397_v19 = vld [vmem:[%s1176_s5 + $0x10] sm:$0xff] (!%p751_p4) }
  0x50   : > { %346 = sbr.rel (%p751_p4) target bundleno = 342 (0x156), region = 81  ;;  %v884_v20 = vpack.c.bf16 (!%p751_p4), %v396_v18, %v395_v17  ;;  %v398_v21 = vld [vmem:[%s1176_s5 + $0x18] sm:$0xff] (!%p751_p4)  ;;  %v399_v23 = vld [vmem:[%s1176_s5 + $0x20] sm:$0xff] (!%p751_p4)  ;;  %v400_v24 = vld [vmem:[%s1176_s5 + $0x28] sm:$0xff] (!%p751_p4) }
  0x51   : > { %v888_v22 = vpack.c.bf16 (!%p751_p4), %v398_v21, %v397_v19  ;;  %v892_v25 = vpack.c.bf16 (!%p751_p4), %v400_v24, %v399_v23  ;;  %v758_v26 = vld [vmem:[%s1183_s20] sm:$0xff] (!%p751_p4)   ;;  %v401_v28 = vld [vmem:[%s1176_s5 + $0x30] sm:$0xff] (!%p751_p4)  ;;  %v402_v29 = vld [vmem:[%s1176_s5 + $0x38] sm:$0xff] (!%p751_p4) }
  0x52   : > { %885 = vmatprep.subr.bf16.mxu0 (!%p751_p4), %v884_v20  ;;  %916 = vmatprep.subr.bf16.mxu1 (!%p751_p4), %v884_v20  ;;  %v792_v27 = vld [vmem:[%s1183_s20 + $0x20] sm:$0xff] (!%p751_p4)   ;;  %v759_v30 = vunpack.c.l.bf16 (!%p751_p4), %v758_v26  ;;  %v896_v32 = vpack.c.bf16 (!%p751_p4), %v402_v29, %v401_v28  ;;  %v404_v34 = vld [vmem:[%s1176_s5 + $0x48] sm:$0xff] (!%p751_p4)  ;;  %v405_v36 = vld [vmem:[%s1176_s5 + $0x50] sm:$0xff] (!%p751_p4)  ;;  %v760_v47 = vunpack.c.h.bf16 (!%p751_p4), %v758_v26 }
  0x53   : > { %887 = vmatpush3.bf16.msra.mxu0 (!%p751_p4), %v884_v20  ;;  %924 = vmatpush3.bf16.msra.mxu1 (!%p751_p4), %v884_v20  ;;  %v775_v31 = vunpack.c.l.bf16 (!%p751_p4), %v792_v27  ;;  %v403_v33 = vld [vmem:[%s1176_s5 + $0x40] sm:$0xff] (!%p751_p4)  ;;  %v406_v37 = vld [vmem:[%s1176_s5 + $0x58] sm:$0xff] (!%p751_p4)  ;;  %v408_v40 = vld [vmem:[%s1176_s5 + $0x68] sm:$0xff] (!%p751_p4)  ;;  %v776_v48 = vunpack.c.h.bf16 (!%p751_p4), %v792_v27 }
  0x54   : > { %889 = vmatprep.subr.bf16.mxu0 (!%p751_p4), %v888_v22  ;;  %917 = vmatprep.subr.bf16.mxu1 (!%p751_p4), %v888_v22  ;;  %v900_v35 = vpack.c.bf16 (!%p751_p4), %v404_v34, %v403_v33  ;;  %v904_v38 = vpack.c.bf16 (!%p751_p4), %v406_v37, %v405_v36  ;;  %v407_v39 = vld [vmem:[%s1176_s5 + $0x60] sm:$0xff] (!%p751_p4)  ;;  %v409_v42 = vld [vmem:[%s1176_s5 + $0x70] sm:$0xff] (!%p751_p4)  ;;  %v410_v43 = vld [vmem:[%s1176_s5 + $0x78] sm:$0xff] (!%p751_p4) }
  0x55   : > { %860 = vmatprep.mubr.f32.mxu0 (!%p751_p4), %v759_v30  ;;  %872 = vmatprep.mubr.f32.mxu1 (!%p751_p4), %v775_v31  ;;  %v908_v41 = vpack.c.bf16 (!%p751_p4), %v408_v40, %v407_v39  ;;  %v912_v44 = vpack.c.bf16 (!%p751_p4), %v410_v43, %v409_v42  ;;  %v789_v45 = vld [vmem:[%s1183_s20 + $0x8] sm:$0xff] (!%p751_p4)   ;;  %v790_v51 = vld [vmem:[%s1183_s20 + $0x10] sm:$0xff] (!%p751_p4)   ;;  %v791_v57 = vld [vmem:[%s1183_s20 + $0x18] sm:$0xff] (!%p751_p4)  }
  0x56   : > { %v793_v46 = vld [vmem:[%s1183_s20 + $0x28] sm:$0xff] (!%p751_p4)   ;;  %v763_v49 = vunpack.c.l.bf16 (!%p751_p4), %v789_v45  ;;  %v794_v52 = vld [vmem:[%s1183_s20 + $0x30] sm:$0xff] (!%p751_p4)   ;;  %v764_v53 = vunpack.c.h.bf16 (!%p751_p4), %v789_v45  ;;  %v767_v55 = vunpack.c.l.bf16 (!%p751_p4), %v790_v51  ;;  %v795_v58 = vld [vmem:[%s1183_s20 + $0x38] sm:$0xff] (!%p751_p4)   ;;  %v768_v59 = vunpack.c.h.bf16 (!%p751_p4), %v790_v51 }
  0x57   : > { %891 = vmatpush3.bf16.msra.mxu0 %v888_v22  ;;  %925 = vmatpush3.bf16.msra.mxu1 %v888_v22  ;;  %v779_v50 = vunpack.c.l.bf16 %v793_v46  ;;  %v780_v54 = vunpack.c.h.bf16 %v793_v46  ;;  %v783_v56 = vunpack.c.l.bf16 %v794_v52  ;;  %v784_v60 = vunpack.c.h.bf16 %v794_v52  ;;  %v348_v1 = vld [vmem:[#allocation2 + $0x8] sm:$0xff]  ;;  %v347_v3 = vld [vmem:[#allocation2] sm:$0xff]  ;;  %v350_v13 = vld [vmem:[#allocation2 + $0x18] sm:$0xff] }
  0x58   : > { %893 = vmatprep.subr.bf16.mxu0 %v892_v25  ;;  %918 = vmatprep.subr.bf16.mxu1 %v892_v25  ;;  %v771_v61 = vunpack.c.l.bf16 %v791_v57  ;;  %v787_v62 = vunpack.c.l.bf16 %v795_v58  ;;  %v772_v63 = vunpack.c.h.bf16 %v791_v57  ;;  %v788_v0 = vunpack.c.h.bf16 %v795_v58  ;;  %v356_v2 = vld [vmem:[#allocation2 + $0x48] sm:$0xff]  ;;  %v355_v4 = vld [vmem:[#allocation2 + $0x40] sm:$0xff]  ;;  %v358_v14 = vld [vmem:[#allocation2 + $0x58] sm:$0xff] }
  0x59   : > { %v349_v15 = vld [vmem:[#allocation2 + $0x10] sm:$0xff]  ;;  %v360_v26 = vld [vmem:[#allocation2 + $0x68] sm:$0xff]  ;;  %v351_v27 = vld [vmem:[#allocation2 + $0x20] sm:$0xff] }
  0x5a   : > { %v357_v16 = vld [vmem:[#allocation2 + $0x50] sm:$0xff]  ;;  %v359_v28 = vld [vmem:[#allocation2 + $0x60] sm:$0xff]  ;;  %v354_v37 = vld [vmem:[#allocation2 + $0x38] sm:$0xff] }
  0x5b   : > { %895 = vmatpush3.bf16.msra.mxu0 %v892_v25  ;;  %926 = vmatpush3.bf16.msra.mxu1 %v892_v25  ;;  %v352_v25 = vld [vmem:[#allocation2 + $0x28] sm:$0xff]  ;;  %v353_v39 = vld [vmem:[#allocation2 + $0x30] sm:$0xff] }
  0x5c   : > { %897 = vmatprep.subr.bf16.mxu0 %v896_v32  ;;  %919 = vmatprep.subr.bf16.mxu1 %v896_v32  ;;  %v361_v40 = vld [vmem:[#allocation2 + $0x70] sm:$0xff] }
  0x5f   : > { %899 = vmatpush3.bf16.msra.mxu0 %v896_v32  ;;  %927 = vmatpush3.bf16.msra.mxu1 %v896_v32 }
  0x60   : > { %901 = vmatprep.subr.bf16.mxu0 %v900_v35  ;;  %920 = vmatprep.subr.bf16.mxu1 %v900_v35 }
  0x63   : > { %903 = vmatpush3.bf16.msra.mxu0 %v900_v35  ;;  %928 = vmatpush3.bf16.msra.mxu1 %v900_v35 }
  0x64   : > { %905 = vmatprep.subr.bf16.mxu0 %v904_v38  ;;  %921 = vmatprep.subr.bf16.mxu1 %v904_v38 }
  0x67   : > { %907 = vmatpush3.bf16.msra.mxu0 %v904_v38  ;;  %929 = vmatpush3.bf16.msra.mxu1 %v904_v38  ;;  %v362_v38 = vld [vmem:[#allocation2 + $0x78] sm:$0xff] }
  0x68   : > { %909 = vmatprep.subr.bf16.mxu0 %v908_v41  ;;  %922 = vmatprep.subr.bf16.mxu1 %v908_v41 }
  0x6b   : > { %911 = vmatpush3.bf16.msra.mxu0 %v908_v41  ;;  %930 = vmatpush3.bf16.msra.mxu1 %v908_v41 }
  0x6c   : > { %913 = vmatprep.subr.bf16.mxu0 %v912_v44  ;;  %923 = vmatprep.subr.bf16.mxu1 %v912_v44 }
  0x6f   : > { %915 = vmatpush3.bf16.msra.mxu0 %v912_v44  ;;  %931 = vmatpush3.bf16.msra.mxu1 %v912_v44 }
  0x72   : > { %861 = vmatmul.mubr.f32.vlgmr.msra.gmra.mrb[0].mxu0 %v760_v47  ;;  %873 = vmatmul.mubr.f32.vlgmr.msra.gmra.mrb[0].mxu1 %v776_v48 }
  0x73   : > { %863 = vmatprep.mubr.f32.mxu0 %v763_v49  ;;  %875 = vmatprep.mubr.f32.mxu1 %v779_v50 }
  0x76   : > { %864 = vmatmul.mubr.f32.gmra.mrb[2].mxu0 %v764_v53  ;;  %876 = vmatmul.mubr.f32.gmra.mrb[2].mxu1 %v780_v54 }
  0x77   : > { %866 = vmatprep.mubr.f32.mxu0 %v767_v55  ;;  %878 = vmatprep.mubr.f32.mxu1 %v783_v56 }
  0x7a   : > { %867 = vmatmul.mubr.f32.gmra.mrb[4].mxu0 %v768_v59  ;;  %879 = vmatmul.mubr.f32.gmra.mrb[4].mxu1 %v784_v60 }
  0x7b   : > { %869 = vmatprep.mubr.f32.mxu0 %v771_v61  ;;  %881 = vmatprep.mubr.f32.mxu1 %v787_v62 }
  0x7e   : > { %870 = vmatmul.mubr.f32.gmra.mrb[6].mxu0 %v772_v63  ;;  %882 = vmatmul.mubr.f32.gmra.mrb[6].mxu1 %v788_v0 }
 0x145   : > { %v862_v5 = vpop.f32.mrb[0].mxu0  ;;  %v874_v6 = vpop.f32.mrb[0].mxu1 }
 0x146   : > { %v557_v7 = vadd.f32 %v862_v5, %v348_v1  ;;  %v565_v8 = vadd.f32 %v874_v6, %v356_v2  ;;  %v477_v9 = vpop.f32.mrb[1].mxu0  ;;  %v517_v10 = vpop.f32.mrb[1].mxu1 }
 0x147   : > { %v556_v11 = vadd.f32 %v477_v9, %v347_v3  ;;  %v564_v12 = vadd.f32 %v517_v10, %v355_v4 }
 0x148   : > { %573 = vst [vmem:[#allocation2 + $0x8] sm:$0xff] %v557_v7  ;;  %581 = vst [vmem:[#allocation2 + $0x48] sm:$0xff] %v565_v8 }
 0x149   : > { %572 = vst [vmem:[#allocation2] sm:$0xff] %v556_v11  ;;  %580 = vst [vmem:[#allocation2 + $0x40] sm:$0xff] %v564_v12  ;;  %v865_v17 = vpop.f32.mrb[2].mxu0  ;;  %v877_v18 = vpop.f32.mrb[2].mxu1 }
 0x14a   : > { %v559_v19 = vadd.f32 %v865_v17, %v350_v13  ;;  %v567_v20 = vadd.f32 %v877_v18, %v358_v14  ;;  %v487_v21 = vpop.f32.mrb[3].mxu0  ;;  %v527_v22 = vpop.f32.mrb[3].mxu1 }
 0x14b   : > { %v558_v23 = vadd.f32 %v487_v21, %v349_v15  ;;  %v566_v24 = vadd.f32 %v527_v22, %v357_v16 }
 0x14c   : > { %575 = vst [vmem:[#allocation2 + $0x18] sm:$0xff] %v559_v19  ;;  %583 = vst [vmem:[#allocation2 + $0x58] sm:$0xff] %v567_v20 }
 0x14d   : > { %574 = vst [vmem:[#allocation2 + $0x10] sm:$0xff] %v558_v23  ;;  %582 = vst [vmem:[#allocation2 + $0x50] sm:$0xff] %v566_v24  ;;  %v868_v29 = vpop.f32.mrb[4].mxu0  ;;  %v880_v30 = vpop.f32.mrb[4].mxu1 }
 0x14e   : > { %v561_v31 = vadd.f32 %v868_v29, %v352_v25  ;;  %v569_v32 = vadd.f32 %v880_v30, %v360_v26  ;;  %v497_v33 = vpop.f32.mrb[5].mxu0  ;;  %v537_v34 = vpop.f32.mrb[5].mxu1 }
 0x14f   : > { %v560_v35 = vadd.f32 %v497_v33, %v351_v27  ;;  %v568_v36 = vadd.f32 %v537_v34, %v359_v28 }
 0x150   : > { %577 = vst [vmem:[#allocation2 + $0x28] sm:$0xff] %v561_v31  ;;  %585 = vst [vmem:[#allocation2 + $0x68] sm:$0xff] %v569_v32 }
 0x151   : > { %576 = vst [vmem:[#allocation2 + $0x20] sm:$0xff] %v560_v35  ;;  %584 = vst [vmem:[#allocation2 + $0x60] sm:$0xff] %v568_v36  ;;  %v871_v41 = vpop.f32.mrb[6].mxu0  ;;  %v883_v42 = vpop.f32.mrb[6].mxu1 }
 0x152   : > { %v563_v43 = vadd.f32 %v871_v41, %v354_v37  ;;  %v571_v44 = vadd.f32 %v883_v42, %v362_v38  ;;  %v507_v45 = vpop.f32.mrb[7].mxu0  ;;  %v547_v46 = vpop.f32.mrb[7].mxu1 }
 0x153   : > { %v562_v47 = vadd.f32 %v507_v45, %v353_v39  ;;  %v570_v48 = vadd.f32 %v547_v46, %v361_v40 }
 0x154   : > { %579 = vst [vmem:[#allocation2 + $0x38] sm:$0xff] %v563_v43  ;;  %587 = vst [vmem:[#allocation2 + $0x78] sm:$0xff] %v571_v44 }
 0x155   : > { %578 = vst [vmem:[#allocation2 + $0x30] sm:$0xff] %v562_v47  ;;  %586 = vst [vmem:[#allocation2 + $0x70] sm:$0xff] %v570_v48 }
 0x156 PF: > { %p752_p5 = scmp.ne.s32.totalorder %s1042_s22, 1 }
 0x157   : > { %v592_v49 = vld [vmem:[#allocation2] sm:$0xff] (!%p752_p5)  ;;  %v593_v51 = vld [vmem:[#allocation2 + $0x8] sm:$0xff] (!%p752_p5)  ;;  %v594_v54 = vld [vmem:[#allocation2 + $0x10] sm:$0xff] (!%p752_p5) }
 0x158   : > { %591 = sbr.rel (%p752_p5) target bundleno = 355 (0x163), region = 85  ;;  %v753_v50 = vld [vmem:[%s1256_s3] ss:$0 sm:$0xff] (!%p752_p5)  ;;  %v595_v55 = vld [vmem:[#allocation2 + $0x18] sm:$0xff] (!%p752_p5)  ;;  %v597_v60 = vld [vmem:[#allocation2 + $0x28] sm:$0xff] (!%p752_p5) }
 0x159   : > { %v615_v52 = vadd.f32 (!%p752_p5), %v753_v50, %v592_v49  ;;  %v616_v53 = vadd.f32 (!%p752_p5), %v753_v50, %v593_v51  ;;  %v596_v56 = vld [vmem:[#allocation2 + $0x20] sm:$0xff] (!%p752_p5)  ;;  %v617_v57 = vadd.f32 (!%p752_p5), %v753_v50, %v594_v54  ;;  %v618_v58 = vadd.f32 (!%p752_p5), %v753_v50, %v595_v55  ;;  %v601_v3 = vld [vmem:[#allocation2 + $0x48] sm:$0xff] (!%p752_p5)  ;;  %v602_v4 = vld [vmem:[#allocation2 + $0x50] sm:$0xff] (!%p752_p5) }
 0x15a   : > { %v619_v59 = vadd.f32 (!%p752_p5), %v753_v50, %v596_v56  ;;  %v620_v63 = vadd.f32 (!%p752_p5), %v753_v50, %v597_v60  ;;  %v600_v2 = vld [vmem:[#allocation2 + $0x40] sm:$0xff] (!%p752_p5)  ;;  %v624_v6 = vadd.f32 (!%p752_p5), %v753_v50, %v601_v3  ;;  %v625_v7 = vadd.f32 (!%p752_p5), %v753_v50, %v602_v4  ;;  %v603_v8 = vld [vmem:[#allocation2 + $0x58] sm:$0xff] (!%p752_p5)  ;;  %v605_v10 = vld [vmem:[#allocation2 + $0x68] sm:$0xff] (!%p752_p5) }
 0x15b   : > { %v599_v62 = vld [vmem:[#allocation2 + $0x38] sm:$0xff] (!%p752_p5)  ;;  %631 = vst [vmem:[%s1181_s10] sm:$0xff] (!%p752_p5), %v615_v52  ;;  %632 = vst [vmem:[%s1181_s10 + $0x8] sm:$0xff] (!%p752_p5), %v616_v53  ;;  %v623_v5 = vadd.f32 (!%p752_p5), %v753_v50, %v600_v2  ;;  %v604_v9 = vld [vmem:[#allocation2 + $0x60] sm:$0xff] (!%p752_p5)  ;;  %v626_v11 = vadd.f32 (!%p752_p5), %v753_v50, %v603_v8  ;;  %v628_v13 = vadd.f32 (!%p752_p5), %v753_v50, %v605_v10 }
 0x15c   : > { %v598_v61 = vld [vmem:[#allocation2 + $0x30] sm:$0xff] (!%p752_p5)  ;;  %v622_v1 = vadd.f32 (!%p752_p5), %v753_v50, %v599_v62  ;;  %633 = vst [vmem:[%s1181_s10 + $0x10] sm:$0xff] (!%p752_p5), %v617_v57  ;;  %634 = vst [vmem:[%s1181_s10 + $0x18] sm:$0xff] (!%p752_p5), %v618_v58  ;;  %v627_v12 = vadd.f32 (!%p752_p5), %v753_v50, %v604_v9  ;;  %v607_v15 = vld [vmem:[#allocation2 + $0x78] sm:$0xff] (!%p752_p5) }
 0x15d   : > { %v621_v0 = vadd.f32 (!%p752_p5), %v753_v50, %v598_v61  ;;  %635 = vst [vmem:[%s1181_s10 + $0x20] sm:$0xff] (!%p752_p5), %v619_v59  ;;  %636 = vst [vmem:[%s1181_s10 + $0x28] sm:$0xff] (!%p752_p5), %v620_v63  ;;  %v606_v14 = vld [vmem:[#allocation2 + $0x70] sm:$0xff] (!%p752_p5)  ;;  %v630_v17 = vadd.f32 (!%p752_p5), %v753_v50, %v607_v15 }
 0x15e   : > { %638 = vst [vmem:[%s1181_s10 + $0x38] sm:$0xff] (!%p752_p5), %v622_v1  ;;  %639 = vst [vmem:[%s1181_s10 + $0x40] sm:$0xff] (!%p752_p5), %v623_v5  ;;  %v629_v16 = vadd.f32 (!%p752_p5), %v753_v50, %v606_v14 }
 0x15f   : > { %637 = vst [vmem:[%s1181_s10 + $0x30] sm:$0xff] %v621_v0  ;;  %640 = vst [vmem:[%s1181_s10 + $0x48] sm:$0xff] %v624_v6 }
 0x160   : > { %641 = vst [vmem:[%s1181_s10 + $0x50] sm:$0xff] %v625_v7  ;;  %642 = vst [vmem:[%s1181_s10 + $0x58] sm:$0xff] %v626_v11 }
 0x161   : > { %643 = vst [vmem:[%s1181_s10 + $0x60] sm:$0xff] %v627_v12  ;;  %644 = vst [vmem:[%s1181_s10 + $0x68] sm:$0xff] %v628_v13 }
 0x162   : > { %645 = vst [vmem:[%s1181_s10 + $0x70] sm:$0xff] %v629_v16  ;;  %646 = vst [vmem:[%s1181_s10 + $0x78] sm:$0xff] %v630_v17 }
 0x163 PF: > { %s20_s25 = sadd.s32 1, %s1058_s25   ;;  %s1258_s20 = smov %s1038_s21 }
 0x164   : > { %p17_p6 = scmp.ge.s32.totalorder %s20_s25, 6   ;;  %s1259_s21 = smov %s1141_s6 }
 0x165   : > { %s1260_s22 = smov %s1050_s23  ;;  %s1261_s0 = smov %s1054_s24 }
 0x166   : > { %s1262_s23 = smov %s1265_s26  ;;  %s1263_s24 = smov %s1269_s27 }
 0x167   :  { %19 = sbr.rel (!%p17_p6) target bundleno = 19 (0x13), region = 123 }

</bundles_post_ra>
